<compile_context>
chip_gen: v5e
topology: v5e:2x2
jax: 0.10.0
libtpu: 0.0.40
codegen_flags: <defaults>
</compile_context>

<pallas_src>
import functools
import numpy as np
import jax
import jax.numpy as jnp
from jax.experimental import pallas as pl
from jax.experimental.pallas import tpu as pltpu


def _round_up(x, m):
    return (x + m - 1) // m * m


def _pick_tile(n, preferred, align):
    """Largest tile <= preferred that divides n (n must be a multiple of align)."""
    if n <= preferred:
        return n
    t = (preferred // align) * align
    while n % t:
        t -= align
    return t


# --------------------------- Tiled Linear kernel ------------------------------
def linear_kernel(x_ref, w_ref, b_ref, o_ref):
    o_ref[...] = (jnp.dot(x_ref[...], w_ref[...],
                          preferred_element_type=jnp.float32) + b_ref[...])


def linear_forward(x, w_t, b, *, tm_pref=256, tn_pref=512):
    """x: (M, K) bf16, w_t: (K, N) bf16, b: (1, N) f32 -> (M, N) f32.

    Requires M % 8 == 0 and N % 128 == 0 (caller pads)."""
    M, K = x.shape
    N = w_t.shape[1]
    tm = _pick_tile(M, tm_pref, 8)
    tn = _pick_tile(N, tn_pref, 128)
    return pl.pallas_call(
        linear_kernel,
        out_shape=jax.ShapeDtypeStruct((M, N), jnp.float32),
        grid_spec=pltpu.PrefetchScalarGridSpec(
            num_scalar_prefetch=0,
            grid=(M // tm, N // tn),
            in_specs=[
                pl.BlockSpec((tm, K), lambda i, j: (i, 0)),
                pl.BlockSpec((K, tn), lambda i, j: (0, j)),
                pl.BlockSpec((1, tn), lambda i, j: (0, j)),
            ],
            out_specs=pl.BlockSpec((tm, tn), lambda i, j: (i, j)),
        ),
        compiler_params=pltpu.CompilerParams(
            dimension_semantics=("parallel", "parallel")),
    )(x, w_t, b)


# -------------------------- Recurrent GRU kernel ------------------------------
def gru_chunk_kernel(gi_ref, len_ref, h0_ref, whh_ref, bhh_ref, out_ref,
                     h_scratch, *, time_chunk, hidden):
    c = pl.program_id(0)

    @pl.when(c == 0)
    def _():
        h_scratch[...] = h0_ref[...]

    Hp = hidden
    h = h_scratch[...]          # (Bp, Hp) f32 carried hidden state
    lens = len_ref[...]         # (Bp, Hp) int32 (length broadcast along lanes)
    whh = whh_ref[...]          # (Hp, 3*Hp) bf16, resident
    bhh = bhh_ref[...]          # (1, 3*Hp) f32, resident

    # Statically unrolled chunk of timesteps; only the recurrent matmul remains.
    for i in range(time_chunk):
        t = c * time_chunk + i
        gi = gi_ref[i]          # (Bp, 3*Hp) f32, precomputed x @ W_ih^T + b_ih
        gh = jnp.dot(h.astype(jnp.bfloat16), whh,
                     preferred_element_type=jnp.float32) + bhh
        r = jax.nn.sigmoid(gi[:, 0:Hp] + gh[:, 0:Hp])
        z = jax.nn.sigmoid(gi[:, Hp:2 * Hp] + gh[:, Hp:2 * Hp])
        n = jnp.tanh(gi[:, 2 * Hp:3 * Hp] + r * gh[:, 2 * Hp:3 * Hp])
        h_new = (1.0 - z) * n + z * h

        # pack/pad semantics: freeze hidden past the valid length, zero output there
        valid = t < lens
        out_ref[i] = jnp.where(valid, h_new, 0.0)
        h = jnp.where(valid, h_new, h)

    h_scratch[...] = h


def gru_forward(gi_tbg, len_bcast, h0, whh_t, bhh, *, time_chunk):
    """gi_tbg: (Tp, Bp, 3*Hp) f32 time-major precomputed input gates.
       Returns (Tp, Bp, Hp) f32 time-major GRU outputs (zeros on padded steps)."""
    Tp, Bp, G = gi_tbg.shape
    Hp = G // 3
    kernel = functools.partial(gru_chunk_kernel, time_chunk=time_chunk, hidden=Hp)
    return pl.pallas_call(
        kernel,
        out_shape=jax.ShapeDtypeStruct((Tp, Bp, Hp), jnp.float32),
        grid_spec=pltpu.PrefetchScalarGridSpec(
            num_scalar_prefetch=0,
            grid=(Tp // time_chunk,),
            in_specs=[
                pl.BlockSpec((time_chunk, Bp, 3 * Hp), lambda c: (c, 0, 0)),  # gi chunk
                pl.BlockSpec((Bp, Hp), lambda c: (0, 0)),                     # lengths (resident)
                pl.BlockSpec((Bp, Hp), lambda c: (0, 0)),                     # h0 (resident)
                pl.BlockSpec((Hp, 3 * Hp), lambda c: (0, 0)),                 # W_hh^T bf16 (resident)
                pl.BlockSpec((1, 3 * Hp), lambda c: (0, 0)),                  # b_hh (resident)
            ],
            out_specs=pl.BlockSpec((time_chunk, Bp, Hp), lambda c: (c, 0, 0)),
            scratch_shapes=[pltpu.VMEM((Bp, Hp), jnp.float32)],
        ),
        compiler_params=pltpu.CompilerParams(
            dimension_semantics=("arbitrary",)),
    )(gi_tbg, len_bcast, h0, whh_t, bhh)


# --------------------------- Padded weight prep -------------------------------
def _prepare_params(params, Ep, Hp, Vp):
    E = params["w_ih"].shape[1]
    H = params["w_hh"].shape[1]
    V = params["w_out"].shape[0]

    def gate_pack(w, in_dim, in_pad):
        # (3H, in_dim) PyTorch layout [r; z; n] -> transposed, per-gate padded (in_pad, 3*Hp)
        wg = w.reshape(3, H, in_dim)
        wg_t = jnp.transpose(wg, (0, 2, 1))                              # (3, in_dim, H)
        wg_t = jnp.pad(wg_t, ((0, 0), (0, in_pad - in_dim), (0, Hp - H)))
        return jnp.transpose(wg_t, (1, 0, 2)).reshape(in_pad, 3 * Hp)

    def gate_bias(b):
        bg = jnp.pad(b.reshape(3, H), ((0, 0), (0, Hp - H)))
        return bg.reshape(1, 3 * Hp)

    return {
        "wih_t": gate_pack(params["w_ih"], E, Ep).astype(jnp.bfloat16),
        "whh_t": gate_pack(params["w_hh"], H, Hp).astype(jnp.bfloat16),
        "bih": gate_bias(params["b_ih"]).astype(jnp.float32),
        "bhh": gate_bias(params["b_hh"]).astype(jnp.float32),
        "wout_t": jnp.pad(params["w_out"].T,
                          ((0, Hp - H), (0, Vp - V))).astype(jnp.bfloat16),
        "bout": jnp.pad(params["b_out"], (0, Vp - V)).reshape(1, Vp).astype(jnp.float32),
    }


# ------------------------------ Full forward ----------------------------------
def reviewdi_forward(params, input_sequence, lengths, h0_rng_key, *, time_chunk=8):
    """input_sequence: (B, T) int32 token ids; lengths: (B,) int32."""
    B, T = input_sequence.shape
    E = params["embedding"].shape[1]
    H = params["w_hh"].shape[1]
    V = params["w_out"].shape[0]

    Bp = _round_up(max(B, 8), 8)
    Hp = _round_up(H, 128)
    Ep = _round_up(E, 128)
    Vp = _round_up(V, 128)
    Tc = time_chunk
    Tp = _round_up(T, Tc)

    lengths = jnp.asarray(lengths, jnp.int32)
    # pad_packed_sequence makes the output time dim data-dependent -> must be static.
    # TODO(synk): max_len requires a host read of `lengths`; pass it as a static arg to jit.
    max_len = int(jnp.max(lengths))

    # sort / unsort bookkeeping: only determines which random h0 row each sample gets
    sorted_idx = jnp.argsort(-lengths)
    reversed_idx = jnp.argsort(sorted_idx)
    hidden = jax.random.normal(h0_rng_key, (B, H), dtype=jnp.float32)
    h0 = hidden[reversed_idx]
    h0_pad = jnp.pad(h0, ((0, Bp - B), (0, Hp - H)))

    pp = _prepare_params(params, Ep, Hp, Vp)

    # embedding lookup (glue) + padding to lane/sublane-dense time-major layout
    emb = params["embedding"][input_sequence]                       # (B, T, E) f32
    emb_pad = jnp.pad(emb, ((0, Bp - B), (0, Tp - T), (0, Ep - E))).astype(jnp.bfloat16)
    x_flat = jnp.transpose(emb_pad, (1, 0, 2)).reshape(Tp * Bp, Ep)  # time-major rows

    # Hoisted input projection: one big matmul instead of T tiny ones in the loop.
    gi_flat = linear_forward(x_flat, pp["wih_t"], pp["bih"])         # (Tp*Bp, 3*Hp) f32
    gi = gi_flat.reshape(Tp, Bp, 3 * Hp)

    # lengths broadcast across the hidden lanes -> in-kernel mask, no per-step mask DMA
    len_bcast = jnp.broadcast_to(
        jnp.pad(lengths, (0, Bp - B))[:, None], (Bp, Hp)).astype(jnp.int32)

    out_tbh = gru_forward(gi, len_bcast, h0_pad, pp["whh_t"], pp["bhh"],
                          time_chunk=Tc)                             # (Tp, Bp, Hp)

    # pad_packed_sequence: time dim = max(length); batch already in original order
    out_bth = jnp.transpose(out_tbh, (1, 0, 2))                      # (Bp, Tp, Hp)
    rows = out_bth[:B, :max_len, :].reshape(B * max_len, Hp).astype(jnp.bfloat16)
    M = rows.shape[0]
    Mp = _round_up(M, 8)
    rows = jnp.pad(rows, ((0, Mp - M), (0, 0)))

    logits = linear_forward(rows, pp["wout_t"], pp["bout"])          # (Mp, Vp) f32
    return logits[:M, :V]                                            # (B*max_len, V)


# ------------------------------ Param init -------------------------------------
def init_params(key, vocab_size, embedding_size, hidden_size):
    ks = jax.random.split(key, 7)
    E, H, V = embedding_size, hidden_size, vocab_size
    s = 1.0 / float(np.sqrt(H))
    return {
        "embedding": jax.random.normal(ks[0], (V, E), dtype=jnp.float32),
        # PyTorch GRU layout, gate order [r, z, n]
        "w_ih": jax.random.uniform(ks[1], (3 * H, E), jnp.float32, -s, s),
        "w_hh": jax.random.uniform(ks[2], (3 * H, H), jnp.float32, -s, s),
        "b_ih": jax.random.uniform(ks[3], (3 * H,), jnp.float32, -s, s),
        "b_hh": jax.random.uniform(ks[4], (3 * H,), jnp.float32, -s, s),
        "w_out": jax.random.uniform(ks[5], (V, H), jnp.float32, -s, s),
        "b_out": jax.random.uniform(ks[6], (V,), jnp.float32, -s, s),
    }


if __name__ == "__main__":
    key = jax.random.PRNGKey(0)
    k_param, k_tok, k_h0 = jax.random.split(key, 3)

    B, T = 4, 8
    E, H, V = 16, 32, 64

    params = init_params(k_param, V, E, H)

    input_sequence = jax.random.randint(k_tok, (B, T), 0, V, dtype=jnp.int32)
    lengths = jnp.array([8, 5, 7, 3], dtype=jnp.int32)   # max == T

    logits = reviewdi_forward(params, input_sequence, lengths, k_h0)
    logits = jax.block_until_ready(logits)

    max_len = int(np.asarray(lengths).max())
    assert logits.shape == (B * max_len, V)
    assert bool(jnp.all(jnp.isfinite(logits)))
    print("KERNEL_OK")
</pallas_src>

<mosaic_0001>
module attributes {stable_mosaic.version = 11 : i64} {
  func.func @linear_kernel(%arg0: i32, %arg1: i32, %arg2: memref<64x128xbf16, #tpu.memory_space<vmem>>, %arg3: memref<128x384xbf16, #tpu.memory_space<vmem>>, %arg4: memref<1x384xf32, #tpu.memory_space<vmem>>, %arg5: memref<64x384xf32, #tpu.memory_space<vmem>>) attributes {dimension_semantics = [#tpu.dimension_semantics<parallel>, #tpu.dimension_semantics<parallel>], iteration_bounds = array<i64: 1, 1>, scalar_prefetch = 0 : i64, scratch_operands = 0 : i64, tpu.core_type = #tpu.core_type<tc>, window_params = [{transform_indices = @transform_0, window_bounds = array<i64: 64, 128>}, {transform_indices = @transform_1, window_bounds = array<i64: 128, 384>}, {transform_indices = @transform_2, window_bounds = array<i64: 1, 384>}, {transform_indices = @transform_3, window_bounds = array<i64: 64, 384>}]} {
    %c0 = arith.constant 0 : index
    %c0_0 = arith.constant 0 : index
    %0 = vector.load %arg2[%c0, %c0_0] : memref<64x128xbf16, #tpu.memory_space<vmem>>, vector<64x128xbf16>
    %c0_1 = arith.constant 0 : index
    %c0_2 = arith.constant 0 : index
    %1 = vector.load %arg3[%c0_1, %c0_2] : memref<128x384xbf16, #tpu.memory_space<vmem>>, vector<128x384xbf16>
    %cst = arith.constant dense<0.000000e+00> : vector<64x384xf32>
    %2 = tpu.matmul %0, %1, %cst {dimension_numbers = #tpu.dot_dimension_numbers<[1], [0], [0], [1], [0, 0, 1, 1], [], []>} : vector<64x128xbf16>, vector<128x384xbf16>, vector<64x384xf32> -> vector<64x384xf32>
    %c0_3 = arith.constant 0 : index
    %c0_4 = arith.constant 0 : index
    %3 = vector.load %arg4[%c0_3, %c0_4] : memref<1x384xf32, #tpu.memory_space<vmem>>, vector<1x384xf32>
    %4 = vector.broadcast %3 : vector<1x384xf32> to vector<64x384xf32>
    %5 = arith.addf %2, %4 : vector<64x384xf32>
    %c0_5 = arith.constant 0 : index
    %c0_6 = arith.constant 0 : index
    %6 = vector.load %arg5[%c0_5, %c0_6] : memref<64x384xf32, #tpu.memory_space<vmem>>, vector<64x384xf32>
    tpu.vector_store %arg5[%c0_5, %c0_6], %5 {strides = array<i32>} : memref<64x384xf32, #tpu.memory_space<vmem>>, vector<64x384xf32>,
    return
  }
  func.func @transform_0(%arg0: i32, %arg1: i32) -> (i32, i32) {
    %c0_i32 = arith.constant 0 : i32
    %c0_i32_0 = arith.constant 0 : i32
    return %arg0, %c0_i32 : i32, i32
  }
  func.func @transform_1(%arg0: i32, %arg1: i32) -> (i32, i32) {
    %c0_i32 = arith.constant 0 : i32
    %c0_i32_0 = arith.constant 0 : i32
    return %c0_i32, %arg1 : i32, i32
  }
  func.func @transform_2(%arg0: i32, %arg1: i32) -> (i32, i32) {
    %c0_i32 = arith.constant 0 : i32
    %c0_i32_0 = arith.constant 0 : i32
    return %c0_i32, %arg1 : i32, i32
  }
  func.func @transform_3(%arg0: i32, %arg1: i32) -> (i32, i32) {
    %c0_i32 = arith.constant 0 : i32
    return %arg0, %arg1 : i32, i32
  }
}

</mosaic_0001>

<bundles_post_ra>
// kernel: tpu_custom_call.1
= control target key start
LH: loop header
LB: loop body
LE: loop exit
PB: predicated region body
PF: predicated region fallthrough
CT: control target
= control target key end

     0   :  { %8 = vsyncpa [#allocation3], 0  ;;  %s713_s0 = inlined_call_operand.hbm [shape: bf16[64,128], index: 0, kind: input, shape index: {}]   ;;  %s714_s1 = inlined_call_operand.hbm [shape: bf16[128,384], index: 1, kind: input, shape index: {}]   ;;  %s715_s2 = inlined_call_operand.hbm [shape: f32[1,384], index: 2, kind: input, shape index: {}]   ;;  %s716_s3 = inlined_call_operand.hbm [shape: f32[64,384], index: 3, kind: output, shape index: {}]  }
   0x1   :  { %9 = vsyncpa [#allocation6], 0  ;;  %s28_s14 = sshll.u32 %s714_s1, 4  ;;  %s29_s14 = int_to_ptr.hbm [resolvable:$true] %s28_s14 }
   0x2   :  { %10 = vsyncpa [#allocation4], 0  ;;  %s651_s15 = smov [#allocation5]   ;;  %s15_s19 = sshll.u32 %s713_s0, 4  ;;  %s16_s19 = int_to_ptr.hbm [resolvable:$true] %s15_s19 }
   0x3   :  { %s30_s16 = sshll.u32 %s651_s15, 4  ;;  %s652_s20 = smov 192   ;;  %s31_s16 = int_to_ptr.vmem [resolvable:$true] %s30_s16 }
   0x4   :  { %s653_s21 = smov 12   ;;  %s654_s22 = smov [#allocation2]  }
   0x5   :  { %36 = dma.hbm_to_vmem [thread:$0]  %s29_s14, 3072, %s31_s16, [#allocation6], %s652_s20, %s652_s20, %s653_s21  }
   0x6   :  { %s17_s23 = sshll.u32 %s654_s22, 4  ;;  %s655_s24 = smov 64   ;;  %s18_s23 = int_to_ptr.vmem [resolvable:$true] %s17_s23 }
   0x7   :  { %s656_s25 = smov 4   ;;  %s42_s27 = sshll.u32 %s715_s2, 4  ;;  %s43_s27 = int_to_ptr.hbm [resolvable:$true] %s42_s27 }
   0x8   :  { %23 = dma.hbm_to_vmem [thread:$0]  %s16_s19, 512, %s18_s23, [#allocation3], %s655_s24, %s655_s24, %s656_s25  }
   0x9   :  { %s657_s28 = smov [#allocation7]  }
   0xa   :  { %s44_s29 = sshll.u32 %s657_s28, 4  ;;  %s45_s29 = int_to_ptr.vmem [resolvable:$true] %s44_s29 }
   0xb   :  { %47 = dma.hbm_to_vmem [thread:$0]  %s43_s27, 48, %s45_s29, [#allocation6]  }
   0xc   :  { %645 = dma.done.wait [#allocation3], 512  }
   0xd   :  { %646 = vsyncadd [#allocation3], 4294966784 }
   0xe   :  { %647 = dma.done.wait [#allocation6], 3120  }
   0xf   :  { %648 = vsyncadd [#allocation6], 4294964176  ;;  %v528_v0 = vld [vmem:[#allocation5 + $0xac] sm:$0xf]  ;;  %v495_v1 = vld [vmem:[#allocation5 + $0xb4] sm:$0xf0] }
  0x10   :  { %v501_v2 = vld [vmem:[#allocation5 + $0xb0] sm:$0xf]  ;;  %v498_v3 = vor.u32 %v528_v0, %v495_v1  ;;  %v530_v4 = vld [vmem:[#allocation5 + $0xb8] sm:$0xf0]  ;;  %v525_v5 = vld [vmem:[#allocation5 + $0x94] sm:$0xf] }
  0x11   :  { %v483_v6 = vld [vmem:[#allocation5 + $0x9c] sm:$0xf0]  ;;  %v502_v7 = vor.u32 %v530_v4, %v501_v2  ;;  %v489_v8 = vld [vmem:[#allocation5 + $0x98] sm:$0xf]  ;;  %v527_v9 = vld [vmem:[#allocation5 + $0xa0] sm:$0xf0] }
  0x12   :  { %v493_v10 = vld [vmem:[#allocation5 + $0xa8] sm:$0xf]  ;;  %289 = vmatpush.bf16.msra.mxu1 %v498_v3  ;;  %v486_v11 = vor.u32 %v525_v5, %v483_v6  ;;  %v529_v12 = vld [vmem:[#allocation5 + $0xb0] sm:$0xf0]  ;;  %v490_v13 = vor.u32 %v527_v9, %v489_v8  ;;  %v522_v15 = vld [vmem:[#allocation5 + $0x7c] sm:$0xf] }
  0x13   :  { %318 = vmatpush.bf16.msra.mxu2 %v502_v7  ;;  %v494_v14 = vor.u32 %v529_v12, %v493_v10  ;;  %v471_v16 = vld [vmem:[#allocation5 + $0x84] sm:$0xf0]  ;;  %v481_v17 = vld [vmem:[#allocation5 + $0x90] sm:$0xf]  ;;  %v477_v18 = vld [vmem:[#allocation5 + $0x80] sm:$0xf] }
  0x14   :  { %v524_v19 = vld [vmem:[#allocation5 + $0x88] sm:$0xf0]  ;;  %v526_v20 = vld [vmem:[#allocation5 + $0x98] sm:$0xf0]  ;;  %v474_v22 = vor.u32 %v522_v15, %v471_v16  ;;  %v469_v23 = vld [vmem:[#allocation5 + $0x78] sm:$0xf] }
  0x15   :  { %531 = vmatpush.bf16.msra.mxu3 %v494_v14  ;;  %v482_v21 = vor.u32 %v526_v20, %v481_v17  ;;  %260 = vmatpush.bf16.msra.mxu0 %v494_v14  ;;  %v523_v24 = vld [vmem:[#allocation5 + $0x80] sm:$0xf0]  ;;  %v478_v25 = vor.u32 %v524_v19, %v477_v18  ;;  %v459_v27 = vld [vmem:[#allocation5 + $0x6c] sm:$0xf0]  ;;  %v465_v28 = vld [vmem:[#allocation5 + $0x68] sm:$0xf] }
  0x16   :  { %290 = vmatpush.bf16.msra.mxu1 %v486_v11  ;;  %v519_v26 = vld [vmem:[#allocation5 + $0x64] sm:$0xf]  ;;  %v521_v29 = vld [vmem:[#allocation5 + $0x70] sm:$0xf0]  ;;  %v470_v30 = vor.u32 %v523_v24, %v469_v23  ;;  %v457_v32 = vld [vmem:[#allocation5 + $0x60] sm:$0xf] }
  0x17   :  { %319 = vmatpush.bf16.msra.mxu2 %v490_v13  ;;  %v462_v31 = vor.u32 %v519_v26, %v459_v27  ;;  %v520_v33 = vld [vmem:[#allocation5 + $0x68] sm:$0xf0]  ;;  %v466_v34 = vor.u32 %v521_v29, %v465_v28  ;;  %v447_v36 = vld [vmem:[#allocation5 + $0x54] sm:$0xf0]  ;;  %v453_v37 = vld [vmem:[#allocation5 + $0x50] sm:$0xf] }
  0x18   :  { %v516_v35 = vld [vmem:[#allocation5 + $0x4c] sm:$0xf]  ;;  %v518_v38 = vld [vmem:[#allocation5 + $0x58] sm:$0xf0]  ;;  %v458_v39 = vor.u32 %v520_v33, %v457_v32  ;;  %v445_v41 = vld [vmem:[#allocation5 + $0x48] sm:$0xf] }
  0x19   :  { %532 = vmatpush.bf16.msra.mxu3 %v482_v21  ;;  %261 = vmatpush.bf16.msra.mxu0 %v482_v21  ;;  %v450_v40 = vor.u32 %v516_v35, %v447_v36  ;;  %v517_v42 = vld [vmem:[#allocation5 + $0x50] sm:$0xf0]  ;;  %v454_v43 = vor.u32 %v518_v38, %v453_v37  ;;  %v435_v45 = vld [vmem:[#allocation5 + $0x3c] sm:$0xf0]  ;;  %v441_v46 = vld [vmem:[#allocation5 + $0x38] sm:$0xf] }
  0x1a   :  { %291 = vmatpush.bf16.msra.mxu1 %v474_v22  ;;  %v513_v44 = vld [vmem:[#allocation5 + $0x34] sm:$0xf]  ;;  %v515_v47 = vld [vmem:[#allocation5 + $0x40] sm:$0xf0]  ;;  %v446_v48 = vor.u32 %v517_v42, %v445_v41  ;;  %v433_v50 = vld [vmem:[#allocation5 + $0x30] sm:$0xf] }
  0x1b   :  { %320 = vmatpush.bf16.msra.mxu2 %v478_v25  ;;  %v438_v49 = vor.u32 %v513_v44, %v435_v45  ;;  %v514_v51 = vld [vmem:[#allocation5 + $0x38] sm:$0xf0]  ;;  %v442_v52 = vor.u32 %v515_v47, %v441_v46  ;;  %v423_v54 = vld [vmem:[#allocation5 + $0x24] sm:$0xf0]  ;;  %v429_v55 = vld [vmem:[#allocation5 + $0x20] sm:$0xf] }
  0x1c   :  { %v510_v53 = vld [vmem:[#allocation5 + $0x1c] sm:$0xf]  ;;  %v512_v56 = vld [vmem:[#allocation5 + $0x28] sm:$0xf0]  ;;  %v434_v57 = vor.u32 %v514_v51, %v433_v50  ;;  %v421_v59 = vld [vmem:[#allocation5 + $0x18] sm:$0xf] }
  0x1d   :  { %533 = vmatpush.bf16.msra.mxu3 %v470_v30  ;;  %262 = vmatpush.bf16.msra.mxu0 %v470_v30  ;;  %v426_v58 = vor.u32 %v510_v53, %v423_v54  ;;  %v511_v60 = vld [vmem:[#allocation5 + $0x20] sm:$0xf0]  ;;  %v430_v61 = vor.u32 %v512_v56, %v429_v55  ;;  %v411_v63 = vld [vmem:[#allocation5 + $0xc] sm:$0xf0]  ;;  %v417_v0 = vld [vmem:[#allocation5 + $0x8] sm:$0xf] }
  0x1e   :  { %292 = vmatpush.bf16.msra.mxu1 %v462_v31  ;;  %v507_v62 = vld [vmem:[#allocation5 + $0x4] sm:$0xf]  ;;  %v509_v1 = vld [vmem:[#allocation5 + $0x10] sm:$0xf0]  ;;  %v422_v2 = vor.u32 %v511_v60, %v421_v59  ;;  %v409_v4 = vld [vmem:[#allocation5] sm:$0xf] }
  0x1f   :  { %321 = vmatpush.bf16.msra.mxu2 %v466_v34  ;;  %v414_v3 = vor.u32 %v507_v62, %v411_v63  ;;  %v508_v5 = vld [vmem:[#allocation5 + $0x8] sm:$0xf0]  ;;  %v418_v6 = vor.u32 %v509_v1, %v417_v0  ;;  %v503_v7 = vld [vmem:[#allocation2] sm:$0xff]  ;;  %v505_v10 = vld [vmem:[#allocation2 + $0x10] sm:$0xff]  ;;  %s658_s0 = smov [#allocation8]   ;;  %s377_s5 = sshll.u32 %s716_s3, 4  ;;  %s378_s5 = int_to_ptr.hbm [resolvable:$true] %s377_s5 }
  0x20   :  { %v410_v8 = vor.u32 %v508_v5, %v409_v4  ;;  %v504_v9 = vld [vmem:[#allocation2 + $0x8] sm:$0xff]  ;;  %v506_v11 = vld [vmem:[#allocation2 + $0x18] sm:$0xff]  ;;  %v100_v12 = vld [vmem:[#allocation7] sm:$0x7]  ;;  %s375_s2 = sshll.u32 %s658_s0, 4  ;;  %s659_s6 = smov 384   ;;  %s376_s2 = int_to_ptr.vmem [resolvable:$true] %s375_s2 }
  0x21   :  { %534 = vmatpush.bf16.msra.mxu3 %v458_v39  ;;  %263 = vmatpush.bf16.msra.mxu0 %v458_v39  ;;  %v690_v13 = vperm.slane %v100_v12, 1  ;;  %v693_v16 = vperm.slane %v100_v12, 2  ;;  %v102_v17 = vperm.slane %v100_v12, 0  ;;  %s660_s7 = smov 24  }
  0x22   :  { %293 = vmatpush.bf16.msra.mxu1 %v450_v40 }
  0x23   :  { %322 = vmatpush.bf16.msra.mxu2 %v454_v43 }
  0x25   :  { %535 = vmatpush.bf16.msra.mxu3 %v446_v48  ;;  %264 = vmatpush.bf16.msra.mxu0 %v446_v48 }
  0x26   :  { %294 = vmatpush.bf16.msra.mxu1 %v438_v49 }
  0x27   :  { %323 = vmatpush.bf16.msra.mxu2 %v442_v52 }
  0x29   :  { %536 = vmatpush.bf16.msra.mxu3 %v434_v57  ;;  %265 = vmatpush.bf16.msra.mxu0 %v434_v57 }
  0x2a   :  { %295 = vmatpush.bf16.msra.mxu1 %v426_v58 }
  0x2b   :  { %324 = vmatpush.bf16.msra.mxu2 %v430_v61 }
  0x2d   :  { %537 = vmatpush.bf16.msra.mxu3 %v422_v2  ;;  %266 = vmatpush.bf16.msra.mxu0 %v422_v2 }
  0x2e   :  { %296 = vmatpush.bf16.msra.mxu1 %v414_v3 }
  0x2f   :  { %325 = vmatpush.bf16.msra.mxu2 %v418_v6 }
  0x31   :  { %297 = vmatmul.bf16.vlgmr.msra.gmra.mxu1 %v503_v7  ;;  %538 = vmatpush.bf16.msra.mxu3 %v410_v8 }
  0x32   :  { %326 = vmatmul.bf16.vlgmr.msra.gmra.mxu2 %v503_v7  ;;  %267 = vmatpush.bf16.msra.mxu0 %v410_v8 }
  0x34   :  { %273 = vmatmul.bf16.vlgmr.msra.gmra.mxu3 %v504_v9 }
  0x35   :  { %268 = vmatmul.bf16.vlgmr.msra.gmra.mxu0 %v503_v7 }
  0x41   :  { %302 = vmatmul.bf16.gmra.mxu1 %v504_v9 }
  0x42   :  { %331 = vmatmul.bf16.gmra.mxu2 %v504_v9 }
  0x44   :  { %278 = vmatmul.bf16.gmra.mxu3 %v505_v10 }
  0x51   :  { %307 = vmatmul.bf16.gmra.mxu1 %v505_v10 }
  0x52   :  { %336 = vmatmul.bf16.gmra.mxu2 %v505_v10 }
  0x54   :  { %283 = vmatmul.bf16.gmra.mxu3 %v506_v11 }
  0x61   :  { %312 = vmatmul.bf16.gmra.mxu1 %v506_v11 }
  0x62   :  { %341 = vmatmul.bf16.gmra.mxu2 %v506_v11 }
  0xae   :  { %v298_v14 = vpop.f32.mrf.mxu1 }
  0xaf   :  { %v299_v15 = vadd.f32 %v298_v14, %v690_v13 }
  0xb1   :  { %348 = vst [vmem:[#allocation8 + $0x8] sm:$0xff] %v299_v15 }
  0xb2   :  { %v269_v24 = vpop.f32.mrf.mxu0 }
  0xb3   :  { %v270_v25 = vadd.f32 %v269_v24, %v102_v17 }
  0xb5   :  { %v327_v18 = vpop.f32.mrf.mxu2  ;;  %347 = vst [vmem:[#allocation8] sm:$0xff] %v270_v25 }
  0xb6   :  { %v328_v19 = vadd.f32 %v327_v18, %v693_v16  ;;  %v300_v20 = vpop.f32.mrf.mxu1 }
  0xb7   :  { %v301_v21 = vadd.f32 %v300_v20, %v690_v13  ;;  %v274_v22 = vpop.f32.mrf.mxu3 }
  0xb8   :  { %349 = vst [vmem:[#allocation8 + $0x10] sm:$0xff] %v328_v19  ;;  %v275_v23 = vadd.f32 %v274_v22, %v102_v17 }
  0xb9   :  { %351 = vst [vmem:[#allocation8 + $0x20] sm:$0xff] %v301_v21 }
  0xba   :  { %353 = vst [vmem:[#allocation8 + $0x30] sm:$0xff] %v275_v23  ;;  %v271_v32 = vpop.f32.mrf.mxu0 }
  0xbb   :  { %v272_v33 = vadd.f32 %v271_v32, %v102_v17 }
  0xbd   :  { %v329_v26 = vpop.f32.mrf.mxu2  ;;  %350 = vst [vmem:[#allocation8 + $0x18] sm:$0xff] %v272_v33 }
  0xbe   :  { %v330_v27 = vadd.f32 %v329_v26, %v693_v16  ;;  %v303_v28 = vpop.f32.mrf.mxu1 }
  0xbf   :  { %v304_v29 = vadd.f32 %v303_v28, %v690_v13  ;;  %v276_v30 = vpop.f32.mrf.mxu3 }
  0xc0   :  { %352 = vst [vmem:[#allocation8 + $0x28] sm:$0xff] %v330_v27  ;;  %v277_v31 = vadd.f32 %v276_v30, %v102_v17 }
  0xc1   :  { %354 = vst [vmem:[#allocation8 + $0x38] sm:$0xff] %v304_v29 }
  0xc2   :  { %356 = vst [vmem:[#allocation8 + $0x48] sm:$0xff] %v277_v31 }
  0xc5   :  { %v332_v34 = vpop.f32.mrf.mxu2 }
  0xc6   :  { %v333_v35 = vadd.f32 %v332_v34, %v693_v16  ;;  %v305_v36 = vpop.f32.mrf.mxu1 }
  0xc7   :  { %v306_v37 = vadd.f32 %v305_v36, %v690_v13  ;;  %v279_v38 = vpop.f32.mrf.mxu3 }
  0xc8   :  { %355 = vst [vmem:[#allocation8 + $0x40] sm:$0xff] %v333_v35  ;;  %v280_v39 = vadd.f32 %v279_v38, %v102_v17 }
  0xc9   :  { %357 = vst [vmem:[#allocation8 + $0x50] sm:$0xff] %v306_v37 }
  0xca   :  { %359 = vst [vmem:[#allocation8 + $0x60] sm:$0xff] %v280_v39 }
  0xcd   :  { %v334_v40 = vpop.f32.mrf.mxu2 }
  0xce   :  { %v335_v41 = vadd.f32 %v334_v40, %v693_v16  ;;  %v308_v42 = vpop.f32.mrf.mxu1 }
  0xcf   :  { %v309_v43 = vadd.f32 %v308_v42, %v690_v13  ;;  %v281_v44 = vpop.f32.mrf.mxu3 }
  0xd0   :  { %358 = vst [vmem:[#allocation8 + $0x58] sm:$0xff] %v335_v41  ;;  %v282_v45 = vadd.f32 %v281_v44, %v102_v17 }
  0xd1   :  { %360 = vst [vmem:[#allocation8 + $0x68] sm:$0xff] %v309_v43 }
  0xd2   :  { %362 = vst [vmem:[#allocation8 + $0x78] sm:$0xff] %v282_v45 }
  0xd5   :  { %v337_v46 = vpop.f32.mrf.mxu2 }
  0xd6   :  { %v338_v47 = vadd.f32 %v337_v46, %v693_v16  ;;  %v310_v48 = vpop.f32.mrf.mxu1 }
  0xd7   :  { %v311_v49 = vadd.f32 %v310_v48, %v690_v13  ;;  %v284_v50 = vpop.f32.mrf.mxu3 }
  0xd8   :  { %361 = vst [vmem:[#allocation8 + $0x70] sm:$0xff] %v338_v47  ;;  %v285_v51 = vadd.f32 %v284_v50, %v102_v17 }
  0xd9   :  { %363 = vst [vmem:[#allocation8 + $0x80] sm:$0xff] %v311_v49 }
  0xda   :  { %365 = vst [vmem:[#allocation8 + $0x90] sm:$0xff] %v285_v51 }
  0xdd   :  { %v339_v52 = vpop.f32.mrf.mxu2 }
  0xde   :  { %v340_v53 = vadd.f32 %v339_v52, %v693_v16  ;;  %v313_v54 = vpop.f32.mrf.mxu1 }
  0xdf   :  { %v314_v55 = vadd.f32 %v313_v54, %v690_v13  ;;  %v286_v56 = vpop.f32.mrf.mxu3 }
  0xe0   :  { %364 = vst [vmem:[#allocation8 + $0x88] sm:$0xff] %v340_v53  ;;  %v287_v57 = vadd.f32 %v286_v56, %v102_v17 }
  0xe1   :  { %366 = vst [vmem:[#allocation8 + $0x98] sm:$0xff] %v314_v55 }
  0xe2   :  { %368 = vst [vmem:[#allocation8 + $0xa8] sm:$0xff] %v287_v57 }
  0xe5   :  { %v342_v58 = vpop.f32.mrf.mxu2 }
  0xe6   :  { %v343_v59 = vadd.f32 %v342_v58, %v693_v16  ;;  %v315_v60 = vpop.f32.mrf.mxu1 }
  0xe7   :  { %v316_v61 = vadd.f32 %v315_v60, %v690_v13 }
  0xe8   :  { %367 = vst [vmem:[#allocation8 + $0xa0] sm:$0xff] %v343_v59 }
  0xe9   :  { %369 = vst [vmem:[#allocation8 + $0xb0] sm:$0xff] %v316_v61 }
  0xed   :  { %v344_v62 = vpop.f32.mrf.mxu2 }
  0xee   :  { %v345_v63 = vadd.f32 %v344_v62, %v693_v16 }
  0xf0   :  { %370 = vst [vmem:[#allocation8 + $0xb8] sm:$0xff] %v345_v63 }
  0xf1   :  { %383 = dma.vmem_to_hbm [thread:$0]  %s376_s2, 3072, %s378_s5, [#allocation4], %s659_s6, %s659_s6, %s660_s7  }
  0xf2   :  { %649 = dma.done.wait [#allocation4], 3072  }
  0xf3   :  { %650 = vsyncadd [#allocation4], 4294964224 }
  0xf4   :  { %388 = vsyncpa [#allocation3], 1 }
  0xf5   :  { %389 = vsyncpa [#allocation6], 1 }
  0xf6   :  { %390 = vsyncpa [#allocation4], 1 }

</bundles_post_ra>
